<compile_context>
chip_gen: v7x
topology: tpu7x:2x2x1
jax: 0.10.0
libtpu: 0.0.40
codegen_flags: <defaults>
</compile_context>

<pallas_src>
import functools

import jax
import jax.numpy as jnp
from jax.experimental import pallas as pl
from jax.experimental.pallas import tpu as pltpu

N_BINS = 15
LANES = 128
_STACK_ROWS = 8        # [count, conf, acc, 0, 0, 0, 0, 0] columns for the MXU dot
_NUM_CORE_SPLITS = 2   # v7x has 2 TensorCores; harmless serial split elsewhere


def _vmem_capacity_bytes():
    """Hardware VMEM capacity with a conservative (v7x-sized) fallback."""
    try:
        info = pltpu.get_tpu_info()
        cap = getattr(info, "vmem_capacity_bytes", None)
        if cap:
            return int(cap)
    except Exception:
        pass
    return 64 * 1024 * 1024


def _ece_bin_kernel(logits_ref, labels_ref, out_ref, *,
                    n_total, tile_n, tiles_per_core):
    ci = pl.program_id(0)   # core-split index ("parallel")
    ti = pl.program_id(1)   # batch-tile index within this core ("arbitrary")

    # Per-core partial-sums block stays resident across the ti axis.
    @pl.when(ti == 0)
    def _init():
        out_ref[...] = jnp.zeros_like(out_ref)

    logits = logits_ref[...].astype(jnp.float32)          # (tn, C)
    labels = labels_ref[...]                               # (tn, 1) int32
    tn, c = logits.shape

    # Row-validity mask: logical (unclamped) row offset, so clamped
    # out-of-range tiles and padded last-tile rows contribute nothing.
    base = (ci * tiles_per_core + ti) * tile_n
    row = jax.lax.broadcasted_iota(jnp.int32, (tn, 1), 0)
    valid = (base + row) < n_total                          # (tn, 1) bool
    valid_f = valid.astype(jnp.float32)

    # conf = max softmax = 1 / sum(exp(logits - row_max)); no full softmax.
    row_max = jnp.max(logits, axis=1, keepdims=True)        # (tn, 1)
    sum_exp = jnp.sum(jnp.exp(logits - row_max), axis=1, keepdims=True)
    conf = jnp.where(valid, pl.reciprocal(sum_exp, approx=False), 0.0)

    # Accuracy: does the label column achieve the row max? (float or-reduce;
    # differs from first-argmax only under exact logit ties)
    col = jax.lax.broadcasted_iota(jnp.int32, (tn, c), 1)
    hit = ((logits == row_max) & (col == labels)).astype(jnp.float32)
    acc_f = jnp.max(hit, axis=1, keepdims=True) * valid_f   # (tn, 1)

    # Cheap binning: bin = clip(ceil(conf*15) - 1, 0, 14)   (torch (lo, up] bins)
    bin_idx = jnp.clip(jnp.ceil(conf * N_BINS).astype(jnp.int32) - 1,
                       0, N_BINS - 1)                       # (tn, 1)
    lane = jax.lax.broadcasted_iota(jnp.int32, (tn, LANES), 1)
    onehot = ((lane == bin_idx) & valid).astype(jnp.float32)  # (tn, 128)

    # stack columns: 0 -> count (valid), 1 -> conf, 2 -> acc (all sanitized,
    # so 0 * anything-finite below; no NaN leaks into the MXU accumulate).
    li = jax.lax.broadcasted_iota(jnp.int32, (tn, _STACK_ROWS), 1)
    stack = (jnp.where(li == 0, valid_f, 0.0)
             + jnp.where(li == 1, conf, 0.0)
             + jnp.where(li == 2, acc_f, 0.0))              # (tn, 8)

    # One MXU dot contracting the row axis produces all per-bin partial sums.
    partial = jax.lax.dot_general(
        stack, onehot,
        dimension_numbers=(((0,), (0,)), ((), ())),
        preferred_element_type=jnp.float32)                 # (8, 128)
    out_ref[...] += partial.reshape(out_ref.shape)


def ece_loss(logits, labels, *, max_tile_n=None):
    """Pallas ECE: logits [N, C] (any float dtype), labels [N] int -> [1] f32."""
    n, c = logits.shape
    labels_2d = labels.astype(jnp.int32).reshape(n, 1)
    itemsize = jnp.dtype(logits.dtype).itemsize

    # --- tile sizing from the hardware VMEM budget -------------------------
    vmem_cap = _vmem_capacity_bytes()
    budget = int(vmem_cap * 0.45)     # headroom for compiler-internal scratch

    # Conservative per-row VMEM bytes:
    #   2x double-buffered logits block        : 2 * C * itemsize
    #   f32 cast + exp temporaries + col iota  : 3 * C * 4
    #   2x lane-padded labels buffer + lane/one-hot/(tn,1) f32 temporaries
    #   (each (tn,1) or (tn,128) slab costs 512 B/row of VMEM)
    per_row = 2 * c * itemsize + 3 * c * 4 + 14 * 512

    tile_cap = max(8, (budget // per_row) // 8 * 8)
    target = max(8, ((4 * 1024 * 1024) // max(c * itemsize, 1)) // 8 * 8)
    tile_n = min(tile_cap, target, 8192)
    if max_tile_n is not None:
        tile_n = min(tile_n, max(8, (max_tile_n // 8) * 8))
    if n <= tile_n:
        tile_n = n                      # single full-extent block (always legal)

    n_tiles = pl.cdiv(n, tile_n)
    tiles_per_core = pl.cdiv(n_tiles, _NUM_CORE_SPLITS)
    grid = (_NUM_CORE_SPLITS, tiles_per_core)

    def data_idx(ci, ti):
        # Clamp so fully out-of-range tiles re-read a valid block; the kernel's
        # logical-offset validity mask zeroes their contribution.
        return (jnp.minimum(ci * tiles_per_core + ti, n_tiles - 1), 0)

    needed = per_row * tile_n + 2 * 1024 * 1024
    vmem_limit = int(min(int(vmem_cap * 0.9), max(16 * 1024 * 1024, needed)))

    cost = pl.CostEstimate(
        flops=n * (8 * c + 2 * _STACK_ROWS * LANES + 64),
        transcendentals=n * c,
        bytes_accessed=n * c * itemsize + n * 4
                       + _NUM_CORE_SPLITS * _STACK_ROWS * LANES * 4,
    )

    kernel = functools.partial(_ece_bin_kernel, n_total=n, tile_n=tile_n,
                               tiles_per_core=tiles_per_core)

    partials = pl.pallas_call(
        kernel,
        out_shape=jax.ShapeDtypeStruct((_NUM_CORE_SPLITS, _STACK_ROWS, LANES),
                                       jnp.float32),
        grid_spec=pltpu.PrefetchScalarGridSpec(
            num_scalar_prefetch=0,
            grid=grid,
            in_specs=[
                pl.BlockSpec((tile_n, c), data_idx),
                pl.BlockSpec((tile_n, 1), data_idx),
            ],
            out_specs=pl.BlockSpec((1, _STACK_ROWS, LANES),
                                   lambda ci, ti: (ci, 0, 0)),
        ),
        compiler_params=pltpu.CompilerParams(
            dimension_semantics=("parallel", "arbitrary"),
            vmem_limit_bytes=vmem_limit,
        ),
        cost_estimate=cost,
    )(logits, labels_2d)

    # Tiny final reduction in JAX: combine per-core bin sums, then ECE.
    sums = jnp.sum(partials, axis=0)                     # (8, 128)
    cnt = sums[0, :N_BINS]
    sum_conf = sums[1, :N_BINS]
    sum_acc = sums[2, :N_BINS]
    prop = cnt / jnp.float32(n)
    safe = jnp.maximum(cnt, 1.0)
    gap = jnp.abs(sum_conf / safe - sum_acc / safe)
    ece = jnp.sum(jnp.where(cnt > 0.0, gap * prop, 0.0))
    return ece.reshape(1)


def _ece_reference(logits, labels, n_bins=N_BINS):
    """Pure-JAX reference mirroring the PyTorch module."""
    sm = jax.nn.softmax(logits.astype(jnp.float32), axis=1)
    conf = jnp.max(sm, axis=1)
    pred = jnp.argmax(sm, axis=1)
    acc = (pred == labels).astype(jnp.float32)
    ece = jnp.zeros((1,), jnp.float32)
    bounds = jnp.linspace(0.0, 1.0, n_bins + 1)
    for b in range(n_bins):
        lo, up = bounds[b], bounds[b + 1]
        in_bin = (conf > lo) & (conf <= up)
        cnt = jnp.sum(in_bin.astype(jnp.float32))
        prop = cnt / conf.shape[0]
        safe = jnp.maximum(cnt, 1.0)
        gap = jnp.abs(jnp.sum(conf * in_bin) / safe - jnp.sum(acc * in_bin) / safe)
        ece = ece + jnp.where(cnt > 0, gap * prop, 0.0)
    return ece


if __name__ == "__main__":
    key = jax.random.PRNGKey(0)
    k1, k2, k3, k4 = jax.random.split(key, 4)

    # Small case matching the module's forward (batch of logits + labels).
    batch, n_classes = 8, 4
    logits = jax.random.normal(k1, (batch, n_classes), dtype=jnp.float32) * 3.0
    labels = jax.random.randint(k2, (batch,), 0, n_classes, dtype=jnp.int32)

    ece = ece_loss(logits, labels)
    jax.block_until_ready(ece)
    ref = _ece_reference(logits, labels)
    assert ece.shape == (1,)
    assert jnp.allclose(ece, ref, atol=2e-5), (ece, ref)

    # Multi-tile case: exercises accumulation, the dual-core split and the
    # partial / fully-out-of-range tile masking.
    batch2, n_classes2 = 300, 10
    logits2 = jax.random.normal(k3, (batch2, n_classes2), dtype=jnp.float32) * 2.0
    labels2 = jax.random.randint(k4, (batch2,), 0, n_classes2, dtype=jnp.int32)

    ece2 = ece_loss(logits2, labels2, max_tile_n=128)
    jax.block_until_ready(ece2)
    ref2 = _ece_reference(logits2, labels2)
    assert jnp.allclose(ece2, ref2, atol=2e-5), (ece2, ref2)

    print("KERNEL_OK")
</pallas_src>

<mosaic_0001>
module attributes {stable_mosaic.version = 11 : i64} {
  func.func @_ece_bin_kernel(%arg0: i32, %arg1: i32, %arg2: memref<8x4xf32, #tpu.memory_space<vmem>>, %arg3: memref<8x1xi32, #tpu.memory_space<vmem>>, %arg4: memref<1x8x128xf32, #tpu.memory_space<vmem>>) attributes {dimension_semantics = [#tpu.dimension_semantics<parallel>, #tpu.dimension_semantics<arbitrary>], iteration_bounds = array<i64: 2, 1>, scalar_prefetch = 0 : i64, scratch_operands = 0 : i64, tpu.core_type = #tpu.core_type<tc>, window_params = [{transform_indices = @transform_0, window_bounds = array<i64: 8, 4>}, {transform_indices = @transform_1, window_bounds = array<i64: 8, 1>}, {transform_indices = @transform_2, window_bounds = array<i64: 1, 8, 128>}]} {
    %c0_i32 = arith.constant 0 : i32
    %0 = arith.cmpi eq, %arg1, %c0_i32 : i32
    %1 = arith.extui %0 : i1 to i32
    %c0_i32_0 = arith.constant 0 : i32
    %2 = arith.cmpi ne, %1, %c0_i32_0 : i32
    scf.if %2 {
      %cst_23 = arith.constant 0.000000e+00 : f32
      %79 = vector.broadcast %cst_23 : f32 to vector<1x8x128xf32>
      %c0_24 = arith.constant 0 : index
      %c0_25 = arith.constant 0 : index
      %c0_26 = arith.constant 0 : index
      %80 = vector.load %arg4[%c0_24, %c0_25, %c0_26] : memref<1x8x128xf32, #tpu.memory_space<vmem>>, vector<1x8x128xf32>
      tpu.vector_store %arg4[%c0_24, %c0_25, %c0_26], %79 {strides = array<i32>} : memref<1x8x128xf32, #tpu.memory_space<vmem>>, vector<1x8x128xf32>,
    } else {
    }
    %c0 = arith.constant 0 : index
    %c0_1 = arith.constant 0 : index
    %3 = vector.load %arg2[%c0, %c0_1] : memref<8x4xf32, #tpu.memory_space<vmem>>, vector<8x4xf32>
    %c0_2 = arith.constant 0 : index
    %c0_3 = arith.constant 0 : index
    %4 = vector.load %arg3[%c0_2, %c0_3] : memref<8x1xi32, #tpu.memory_space<vmem>>, vector<8x1xi32>
    %c1_i32 = arith.constant 1 : i32
    %5 = arith.muli %arg0, %c1_i32 : i32
    %6 = arith.addi %5, %arg1 : i32
    %c8_i32 = arith.constant 8 : i32
    %7 = arith.muli %6, %c8_i32 : i32
    %8 = tpu.iota {dimensions = array<i32: 0>} : vector<8x1xi32>
    %9 = vector.broadcast %7 : i32 to vector<8x1xi32>
    %10 = arith.addi %9, %8 : vector<8x1xi32>
    %c8_i32_4 = arith.constant 8 : i32
    %11 = vector.broadcast %c8_i32_4 : i32 to vector<8x1xi32>
    %12 = arith.cmpi slt, %10, %11 : vector<8x1xi32>
    %13 = arith.extui %12 : vector<8x1xi1> to vector<8x1xi32>
    %14 = arith.sitofp %13 : vector<8x1xi32> to vector<8x1xf32>
    %cst = arith.constant dense<0xFF800000> : vector<8xf32>
    %15 = vector.multi_reduction <maximumf>, %3, %cst [1] : vector<8x4xf32> to vector<8xf32>
    %16 = vector.shape_cast %15 : vector<8xf32> to vector<8x1xf32>
    %17 = vector.broadcast %16 : vector<8x1xf32> to vector<8x4xf32>
    %18 = arith.subf %3, %17 : vector<8x4xf32>
    %19 = math.exp %18 : vector<8x4xf32>
    %cst_5 = arith.constant dense<0.000000e+00> : vector<8xf32>
    %20 = vector.multi_reduction <add>, %19, %cst_5 [1] : vector<8x4xf32> to vector<8xf32>
    %21 = vector.shape_cast %20 : vector<8xf32> to vector<8x1xf32>
    %22 = tpu.reciprocal %21 : vector<8x1xf32> -> vector<8x1xf32>
    %cst_6 = arith.constant 0.000000e+00 : f32
    %23 = vector.broadcast %cst_6 : f32 to vector<8x1xf32>
    %24 = arith.select %12, %22, %23 : vector<8x1xi1>, vector<8x1xf32>
    %25 = tpu.iota {dimensions = array<i32: 1>} : vector<8x4xi32>
    %26 = vector.broadcast %16 : vector<8x1xf32> to vector<8x4xf32>
    %27 = arith.cmpf oeq, %3, %26 : vector<8x4xf32>
    %28 = vector.broadcast %4 : vector<8x1xi32> to vector<8x4xi32>
    %29 = arith.cmpi eq, %25, %28 : vector<8x4xi32>
    %30 = arith.andi %27, %29 : vector<8x4xi1>
    %31 = arith.extui %30 : vector<8x4xi1> to vector<8x4xi32>
    %32 = arith.sitofp %31 : vector<8x4xi32> to vector<8x4xf32>
    %cst_7 = arith.constant dense<0xFF800000> : vector<8xf32>
    %33 = vector.multi_reduction <maximumf>, %32, %cst_7 [1] : vector<8x4xf32> to vector<8xf32>
    %34 = vector.shape_cast %33 : vector<8xf32> to vector<8x1xf32>
    %35 = arith.mulf %34, %14 : vector<8x1xf32>
    %cst_8 = arith.constant 1.500000e+01 : f32
    %36 = vector.broadcast %cst_8 : f32 to vector<8x1xf32>
    %37 = arith.mulf %24, %36 : vector<8x1xf32>
    %38 = math.ceil %37 : vector<8x1xf32>
    %39 = arith.fptosi %38 : vector<8x1xf32> to vector<8x1xi32>
    %c1_i32_9 = arith.constant 1 : i32
    %40 = vector.broadcast %c1_i32_9 : i32 to vector<8x1xi32>
    %41 = arith.subi %39, %40 : vector<8x1xi32>
    %c0_i32_10 = arith.constant 0 : i32
    %c14_i32 = arith.constant 14 : i32
    %42 = vector.broadcast %c0_i32_10 : i32 to vector<8x1xi32>
    %43 = arith.maxsi %42, %41 : vector<8x1xi32>
    %44 = vector.broadcast %c14_i32 : i32 to vector<8x1xi32>
    %45 = arith.minsi %44, %43 : vector<8x1xi32>
    %46 = tpu.iota {dimensions = array<i32: 1>} : vector<8x128xi32>
    %47 = vector.broadcast %45 : vector<8x1xi32> to vector<8x128xi32>
    %48 = arith.cmpi eq, %46, %47 : vector<8x128xi32>
    %49 = vector.broadcast %12 : vector<8x1xi1> to vector<8x128xi1>
    %50 = arith.andi %48, %49 : vector<8x128xi1>
    %51 = arith.extui %50 : vector<8x128xi1> to vector<8x128xi32>
    %52 = arith.sitofp %51 : vector<8x128xi32> to vector<8x128xf32>
    %53 = tpu.iota {dimensions = array<i32: 1>} : vector<8x8xi32>
    %c0_i32_11 = arith.constant 0 : i32
    %54 = vector.broadcast %c0_i32_11 : i32 to vector<8x8xi32>
    %55 = arith.cmpi eq, %53, %54 : vector<8x8xi32>
    %cst_12 = arith.constant 0.000000e+00 : f32
    %56 = vector.shape_cast %14 : vector<8x1xf32> to vector<8x1xf32>
    %57 = vector.broadcast %56 : vector<8x1xf32> to vector<8x8xf32>
    %58 = vector.broadcast %cst_12 : f32 to vector<8x8xf32>
    %59 = arith.select %55, %57, %58 : vector<8x8xi1>, vector<8x8xf32>
    %c1_i32_13 = arith.constant 1 : i32
    %60 = vector.broadcast %c1_i32_13 : i32 to vector<8x8xi32>
    %61 = arith.cmpi eq, %53, %60 : vector<8x8xi32>
    %cst_14 = arith.constant 0.000000e+00 : f32
    %62 = vector.shape_cast %24 : vector<8x1xf32> to vector<8x1xf32>
    %63 = vector.broadcast %62 : vector<8x1xf32> to vector<8x8xf32>
    %64 = vector.broadcast %cst_14 : f32 to vector<8x8xf32>
    %65 = arith.select %61, %63, %64 : vector<8x8xi1>, vector<8x8xf32>
    %66 = arith.addf %59, %65 : vector<8x8xf32>
    %c2_i32 = arith.constant 2 : i32
    %67 = vector.broadcast %c2_i32 : i32 to vector<8x8xi32>
    %68 = arith.cmpi eq, %53, %67 : vector<8x8xi32>
    %cst_15 = arith.constant 0.000000e+00 : f32
    %69 = vector.shape_cast %35 : vector<8x1xf32> to vector<8x1xf32>
    %70 = vector.broadcast %69 : vector<8x1xf32> to vector<8x8xf32>
    %71 = vector.broadcast %cst_15 : f32 to vector<8x8xf32>
    %72 = arith.select %68, %70, %71 : vector<8x8xi1>, vector<8x8xf32>
    %73 = arith.addf %66, %72 : vector<8x8xf32>
    %cst_16 = arith.constant dense<0.000000e+00> : vector<8x128xf32>
    %74 = tpu.matmul %73, %52, %cst_16 {dimension_numbers = #tpu.dot_dimension_numbers<[0], [0], [1], [1], [0, 1, 1, 1], [], []>} : vector<8x8xf32>, vector<8x128xf32>, vector<8x128xf32> -> vector<8x128xf32>
    %c0_17 = arith.constant 0 : index
    %c0_18 = arith.constant 0 : index
    %c0_19 = arith.constant 0 : index
    %75 = vector.load %arg4[%c0_17, %c0_18, %c0_19] : memref<1x8x128xf32, #tpu.memory_space<vmem>>, vector<1x8x128xf32>
    %76 = vector.shape_cast %74 : vector<8x128xf32> to vector<1x8x128xf32>
    %77 = arith.addf %75, %76 : vector<1x8x128xf32>
    %c0_20 = arith.constant 0 : index
    %c0_21 = arith.constant 0 : index
    %c0_22 = arith.constant 0 : index
    %78 = vector.load %arg4[%c0_20, %c0_21, %c0_22] : memref<1x8x128xf32, #tpu.memory_space<vmem>>, vector<1x8x128xf32>
    tpu.vector_store %arg4[%c0_20, %c0_21, %c0_22], %77 {strides = array<i32>} : memref<1x8x128xf32, #tpu.memory_space<vmem>>, vector<1x8x128xf32>,
    return
  }
  func.func @transform_0(%arg0: i32, %arg1: i32) -> (i32, i32) {
    %c1_i32 = arith.constant 1 : i32
    %0 = arith.muli %arg0, %c1_i32 : i32
    %1 = arith.addi %0, %arg1 : i32
    %c0_i32 = arith.constant 0 : i32
    %2 = arith.minsi %1, %c0_i32 : i32
    %c0_i32_0 = arith.constant 0 : i32
    %c0_i32_1 = arith.constant 0 : i32
    return %2, %c0_i32_0 : i32, i32
  }
  func.func @transform_1(%arg0: i32, %arg1: i32) -> (i32, i32) {
    %c1_i32 = arith.constant 1 : i32
    %0 = arith.muli %arg0, %c1_i32 : i32
    %1 = arith.addi %0, %arg1 : i32
    %c0_i32 = arith.constant 0 : i32
    %2 = arith.minsi %1, %c0_i32 : i32
    %c0_i32_0 = arith.constant 0 : i32
    %c0_i32_1 = arith.constant 0 : i32
    return %2, %c0_i32_0 : i32, i32
  }
  func.func @transform_2(%arg0: i32, %arg1: i32) -> (i32, i32, i32) {
    %c0_i32 = arith.constant 0 : i32
    %c0_i32_0 = arith.constant 0 : i32
    %c0_i32_1 = arith.constant 0 : i32
    return %arg0, %c0_i32, %c0_i32_0 : i32, i32, i32
  }
}

</mosaic_0001>

<bundles_post_ra>
// kernel: tpu_custom_call.1
= control target key start
LH: loop header
LB: loop body
LE: loop exit
PB: predicated region body
PF: predicated region fallthrough
CT: control target
= control target key end

     0   :  { %7 = vsyncpa [#allocation3], 0  ;;  %s795_s0 = inlined_call_operand.vmem [shape: f32[8,4], index: 0, kind: input, shape index: {}]   ;;  %s796_s1 = inlined_call_operand.vmem [shape: s32[8,1], index: 1, kind: input, shape index: {}]   ;;  %s797_s2 = inlined_call_operand.hbm [shape: f32[2,8,128], index: 2, kind: output, shape index: {}]  }
   0x1   :  { %9 = vsyncpa [#allocation3 + $0x1], 0  ;;  %s673_s9 = smov 0   ;;  %s675_s10 = smov 0  }
   0x2   :  { %s677_s11 = smov 0   ;;  %s679_s12 = smov 0  }
   0x3   :  { %s681_s13 = smov 0   ;;  %s683_s14 = smov 0  }
   0x4 LB: > { %s475_s15 = sadd.s32 4294967295, %s651_s14   ;;  %s476_s16 = sadd.s32 4294967294, %s651_s14   ;;  %s651_s14 = sphi %s683_s14, %s15_s14   ;;  %s647_s13 = sphi %s681_s13, %s804_s13   ;;  %s643_s12 = sphi %s679_s12, %s803_s12   ;;  %s639_s11 = sphi %s677_s11, %s802_s11   ;;  %s635_s10 = sphi %s675_s10, %s801_s10   ;;  %s631_s9 = sphi %s673_s9, %s800_s9  }
   0x5   : > { %s27_s17 = sadd.s32 1, %s647_s13  ;;  %s98_s18 = sadd.s32 1, %s639_s11 }
   0x6   : > { %p29_p0 = scmp.ge.s32.totalorder %s27_s17, 2  ;;  %p108_p1 = scmp.ne.s32.totalorder %s639_s11, %s635_s10 }
   0x7   : > { %p109_p2 = scmp.eq.s32.totalorder %s475_s15, 1  ;;  %p114_p3 = scmp.ne.s32.totalorder %s635_s10, %s631_s9 }
   0x8   : > { %s806_s17 = smov (%p29_p0, %s27_s17), 0  ;;  %p115_p5 = scmp.eq.s32.totalorder %s476_s16, 1 }
   0x9   : > { %p713_p4 = por %p109_p2, %p108_p1  ;;  %s95_s20 = ssub.s32 %s647_s13, %s806_s17 }
   0xa   : > { %p479_p6 = scmp.ge.s32.totalorder %s651_s14, 1  ;;  %p96_p7 = scmp.eq.s32.totalorder %s95_s20, 0 }
   0xb   : > { %p720_p8 = por %p115_p5, %p114_p3  ;;  %p159_p9 = scmp.lt.s32.totalorder %s651_s14, 3 }
   0xc   : > { %s726_s22 = scalar_select %p96_p7, %s639_s11, %s98_s18  }
   0xd   : > { %p160_p10 = pnand %p479_p6, %p159_p9 }
   0xe   : > { %p191_p11 = scmp.lt.s32.totalorder (!%p160_p10), %s643_s12, 0  ;;  %v653_v0 = vmov (!%p160_p10), 0   ;;  %vm226_vm0 = vcmask (!%p160_p10), 31744   ;;  %v654_v4 = vmov (!%p160_p10), 0.0   ;;  %v219_v8 = vlaneseq (!%p160_p10)  ;;  %s489_s3 = sshll.u32 (!%p160_p10), %s643_s12, 3 }
   0xf   : > { %163 = sbr.rel (%p160_p10) target bundleno = 701 (0x2bd), region = 28  ;;  %568 = vset.pattern.permute.xlu0 (!%p160_p10), %v653_v0  ;;  %502 = vmatprep.subr.mxu0 (!%p160_p10), %v654_v4  ;;  %vm655_vm4 = vmmov (!%p160_p10), 0   ;;  %v221_v16 = vstv (!%p160_p10), %s489_s3  ;;  %v656_v36 = vmov (!%p160_p10), 1.0   ;;  %vm305_vm13 = vcmask (!%p160_p10), 64512   ;;  %s187_s4 = sand.u32 (!%p160_p10), 1, %s635_s10  }
  0x10   : > { %v239_v9 = vand.u32 (!%p160_p10), 127, %v219_v8  ;;  %504 = vmatprep.mubr.msk.f32.mxu0 (!%p160_p10), %vm655_vm4, %v654_v4  ;;  %v220_v15 = vshrl.u32 (!%p160_p10), %v219_v8, 7  ;;  %s480_s5 = sshll.u32 (!%p160_p10), %s187_s4, 3  ;;  %s497_s6 = sshll.u32 (!%p160_p10), %s643_s12, 7 }
  0x11   : > { %s189_s7 = scalar_lea.vmem (!%p160_p10), [#allocation2], %s480_s5  ;;  %s748_s18 = scalar_lea.hbm (!%p160_p10), %s797_s2, %s497_s6 }
  0x12   : > { %v222_v18 = vadd.s32 (!%p160_p10), %v221_v16, %v220_v15  ;;  %vm265_vm6 = vcmp.eq.s32.totalorder (!%p160_p10), %v239_v9, 0  ;;  %vm267_vm7 = vcmp.eq.s32.totalorder (!%p160_p10), %v239_v9, 1  ;;  %vm270_vm8 = vcmp.eq.s32.totalorder (!%p160_p10), %v239_v9, 2  ;;  %s396_s8 = sshll.u32 (!%p160_p10), %s189_s7, 4  ;;  %s383_s20 = scalar_lea.sflag (!%p160_p10), [#allocation3], %s187_s4  ;;  %s750_s8 = int_to_ptr.vmem [resolvable:$true] %s396_s8 }
  0x14   : > { %vm223_vm5 = vcmp.lt.s32.totalorder (!%p160_p10), %v222_v18, 8 }
  0x15   : > { %v490_v19 = vsel (!%p160_p10), %vm223_vm5, 1.0, %v654_v4 }
  0x16   : > { %s192_s23 = scalar_select %p191_p11, %s643_s12, 0  ;;  %v266_v22 = vsel %vm265_vm6, %v490_v19, 0.0 }
  0x17   : > { %s657_s12 = smov [#allocation2]  }
  0x18   : > { %s808_s23 = smov (!%p191_p11, %s192_s23), 0 }
  0x19   : > { %s484_s24 = sshll.u32 %s808_s23, 3  ;;  %s573_s23 = scalar_lea.vmem %s750_s8, 128 }
  0x1a   : > { %s196_s27 = scalar_lea.vmem %s795_s0, %s484_s24  ;;  %s206_s30 = scalar_lea.vmem %s796_s1, %s484_s24 }
  0x1b   : > { %v215_v1 = vld [vmem:[%s196_s27] sm:$0xff]  ;;  %p574_p12 = scmp.ne.s32.totalorder %s750_s8, %s573_s23  ;;  %s577_s24 = sshll.u32 %s657_s12, 4  ;;  %s578_s24 = int_to_ptr.vmem [resolvable:$false] %s577_s24 }
  0x1c   : > { %v227_v2 = vsel %vm226_vm0, %v215_v1, -inf  ;;  %v216_v3 = vld [vmem:[%s206_s30] sm:$0xff]  ;;  %s579_s25 = scalar_lea.vmem %s578_s24, 256  ;;  %p580_p1 = scmp.lt.s32.totalorder %s750_s8, %s578_s24 }
  0x1d   : > { %228 = vmax.xlane.f32.xlu0 %v227_v2  ;;  %p575_p13 = pnand %p574_p12, %p713_p4  ;;  %p581_p2 = scmp.lt.s32.totalorder %s579_s25, %s573_s23 }
  0x1f   : > { %p576_p0 = pneg %p575_p13  ;;  %p582_p3 = por %p581_p2, %p580_p1 }
  0x21   : > { %p583_p5 = pnand %p582_p3, %p576_p0 }
  0x33   : > { %242 = vperm.xlu0 %568, %v216_v3  }
  0xaa   : > { %v229_v5 = vpop.xlane.xlu0 %228 }
  0xab   : > { %v230_v6 = vsub.f32 %v215_v1, %v229_v5  ;;  %vm240_vm2 = vcmp.eq.f32.partialorder %v215_v1, %v229_v5 }
  0xad   : > { %v231_v7 = vmul.f32 1.442695, %v230_v6 }
  0xaf   : > { %569 = vpow2.f32 %v231_v7 }
  0xb2   : > { %v243_v10 = vpop.permute.xlu0 %242 }
  0xb3   : > { %vm244_vm1 = vcmp.eq.s32.totalorder %v239_v9, %v243_v10 }
  0xb4   : > { %vm245_vm3 = vmand %vm240_vm2, %vm244_vm1 }
  0xb5   : > { %v491_v13 = vsel %vm245_vm3, 1.0, %v654_v4 }
  0xb6   : > { %v248_v14 = vsel %vm226_vm0, %v491_v13, -inf }
  0xb9   : > { %v570_v11 = vpop.eup %569 }
  0xba   : > { %v233_v12 = vsel %vm226_vm0, %v570_v11, 0.0 }
  0xbb   : > { %234 = vadd.xlane.f32.xlu1 %v233_v12 }
  0xbf   : > { %249 = vmax.xlane.f32.xlu1 %v248_v14 }
 0x148   : > { %v235_v17 = vpop.xlane.xlu1 %234 }
 0x149   : > { %571 = vrcp.f32 %v235_v17 }
 0x14c   : > { %v250_v20 = vpop.xlane.xlu1 %249 }
 0x14d   : > { %v251_v23 = vmul.f32 %v490_v19, %v250_v20 }
 0x14f   : > { %v271_v29 = vsel %vm270_vm8, %v251_v23, 0.0 }
 0x153   : > { %v572_v21 = vpop.eup %571 }
 0x154   : > { %v237_v24 = vsel %vm223_vm5, %v572_v21, 0.0 }
 0x155   : > { %v252_v25 = vmul.f32 15.0, %v237_v24  ;;  %v268_v26 = vsel %vm267_vm7, %v237_v24, 0.0 }
 0x156   : > { %v269_v27 = vadd.f32 %v268_v26, %v266_v22 }
 0x157   : > { %v253_v28 = vceil.f32 %v252_v25 }
 0x158   : > { %v272_v30 = vadd.f32 %v271_v29, %v269_v27 }
 0x159   : > { %v507_v31 = vtrunc.f32 %v253_v28 }
 0x15a   : > { %273 = vxpose.xlu1.b32.start.end [1/1] (short) (narrow) %v272_v30, 8 }
 0x15b   : > { %v508_v32 = vcvt.f32.s32 %v507_v31 }
 0x15d   : > { %v492_v33 = vadd.s32 4294967295, %v508_v32 }
 0x15f   : > { %vm256_vm9 = vcmp.gt.s32.totalorder %v492_v33, 0 }
 0x160   : > { %v257_v34 = vsel %vm256_vm9, %v492_v33, 0 }
 0x161   : > { %vm258_vm10 = vcmp.lt.s32.totalorder %v257_v34, 14 }
 0x162   : > { %v259_v35 = vsel %vm258_vm10, %v257_v34, 14 }
 0x163   : > { %vm260_vm11 = vcmp.eq.s32.totalorder %v239_v9, %v259_v35 }
 0x164   : > { %vm262_vm12 = vmand %vm260_vm11, %vm223_vm5 }
 0x165   : > { %503 = vmatpush3.msk.msra.mxu0 %vm262_vm12, %v656_v36 }
 0x1da   : > { %v289_v37 = vpop.trf.xlu1 }
 0x1db   : > { %505 = vmatmul.mubr.msk.f32.vlgmr.msra.gmra.mrb[0].mxu0 %vm305_vm13, %v289_v37 }
 0x2ae   : > { %v375_v38 = vpop.f32.mrb[0].mxu0 }
 0x2af   : > { %v506_v39 = vpop.f32.mrb[1].mxu0  ;;  %381 = vst [vmem:[%s189_s7] sm:$0xff] %v375_v38 }
 0x2b0   : > { %586 = shalt.err (!%p583_p5)
}
 0x2b1   : > { %s587_s26 = scalar_lea.hbm %s748_s18, 128  ;;  %s591_s29 = scalar_lea.hbm %s797_s2, 256 }
 0x2b2   : > { %p588_p6 = scmp.ne.s32.totalorder %s748_s18, %s587_s26  ;;  %p592_p10 = scmp.lt.u32.totalorder %s748_s18, %s797_s2 }
 0x2b3   : > { %p593_p11 = scmp.lt.u32.totalorder %s591_s29, %s587_s26  ;;  %p595_p13 = scmp.lt.u32.totalorder %s587_s26, %s748_s18 }
 0x2b4   : > { %p589_p7 = pnand %p588_p6, %p713_p4 }
 0x2b5   : > { %p594_p12 = por %p593_p11, %p592_p10 }
 0x2b6   : > { %p590_p9 = pneg %p589_p7 }
 0x2b7   : > { %p596_p0 = por %p595_p13, %p594_p12 }
 0x2b9   : > { %p597_p1 = pnand %p596_p0, %p590_p9 }
 0x2bb   : > { %600 = shalt.err (!%p597_p1)
}
 0x2bc   : > { %509 = dma.vmem_to_hbm [thread:$0]  (%p713_p4), %s750_s8, 128, %s748_s18, %s383_s20  }
 0x2bd PF: > { %p515_p2 = scmp.ge.s32.totalorder %s651_s14, 2  ;;  %s408_s4 = sand.u32 1, %s631_s9  }
 0x2be   : > { %s409_s5 = scalar_lea.sflag [#allocation3], %s408_s4 }
 0x2bf   : > { %p512_p3 = pnand %p515_p2, %p720_p8 }
 0x2c1   : > { %626 = dma.done.wait (!%p512_p3), %s409_s5, 128  }
 0x2c2   : > { %628 = vsyncadd (!%p512_p3), %s409_s5, 4294967168  ;;  %s15_s14 = sadd.s32 1, %s651_s14   ;;  %s800_s9 = smov %s635_s10 }
 0x2c3   : > { %p12_p5 = scmp.ge.s32.totalorder %s15_s14, 4   ;;  %s801_s10 = smov %s639_s11 }
 0x2c4   : > { %s802_s11 = smov %s726_s22  ;;  %s803_s12 = smov %s647_s13 }
 0x2c5   : > { %s804_s13 = smov %s806_s17  ;;  %14 = sbr.rel (!%p12_p5) target bundleno = 4 (0x4), region = 70 }
 0x2cc   :  { %414 = vsyncpa [#allocation3], 1 }
 0x2cd   :  { %416 = vsyncpa [#allocation3 + $0x1], 1 }

</bundles_post_ra>
